<compile_context>
chip_gen: v7x
topology: tpu7x:2x2x1
jax: 0.10.0
libtpu: 0.0.40
codegen_flags: <defaults>
</compile_context>

<pallas_src>
import jax
import jax.numpy as jnp
from jax import lax
from jax.experimental import pallas as pl
from jax.experimental.pallas import tpu as pltpu


def _encoder_kernel(tok_ref, emb_ref, w_ref, b_ref, o_ref):
    """Fused one-hot gather + linear + max-pool for one batch tile.

    tok_ref: (TB*L, 1) int32 token ids for this batch tile (VMEM)
    emb_ref: (V, H)    f32 embedding table, resident in VMEM
    w_ref:   (H, H)    f32 PyTorch Linear weight (out_features, in_features)
    b_ref:   (1, H)    f32 bias
    o_ref:   (TB, H)   f32 output block for this batch tile
    """
    TBL = tok_ref.shape[0]
    V, H = emb_ref.shape
    TB = o_ref.shape[0]
    L = TBL // TB

    # --- Embedding gather via one-hot matmul on the MXU (no scalar loads). ---
    tok = tok_ref[...]                                            # (TB*L, 1)
    vocab_ids = lax.broadcasted_iota(jnp.int32, (TBL, V), 1)      # lane iota
    onehot = (tok == vocab_ids).astype(jnp.float32)               # (TB*L, V)
    e = jnp.dot(onehot, emb_ref[...],
                preferred_element_type=jnp.float32)               # (TB*L, H)

    # --- One MXU matmul for the whole tile. Contract last dim of e with last
    # dim of W (== e @ W.T) so no transpose of W is needed in-kernel. ---
    y = lax.dot_general(
        e, w_ref[...],
        dimension_numbers=(((1,), (1,)), ((), ())),
        preferred_element_type=jnp.float32)                       # (TB*L, H)

    # --- Max over the sequence per batch element; bias hoisted past the max
    # (identical math: b is constant over L). Static slices, unrolled. ---
    maxes = [jnp.max(y[bb * L:(bb + 1) * L, :], axis=0, keepdims=True)
             for bb in range(TB)]
    o_ref[...] = jnp.concatenate(maxes, axis=0) + b_ref[...]


def sentence_encoder_forward(tokens, emb_table, w, b, *, batch_tile=None):
    """tokens: (B, L) int32; emb_table: (V, H); w: (H, H); b: (H,) -> (B, H)."""
    B, L = tokens.shape
    V, H = emb_table.shape
    TB = B if batch_tile is None else batch_tile
    assert B % TB == 0, "batch_tile must divide the batch size"
    n_tiles = B // TB

    tok_col = tokens.reshape(B * L, 1).astype(jnp.int32)   # row-major: tile-contiguous
    b2d = b.reshape(1, H)

    cost = pl.CostEstimate(
        flops=2 * B * L * V * H + 2 * B * L * H * H,
        transcendentals=0,
        bytes_accessed=(tok_col.size * 4 + emb_table.size * 4
                        + w.size * 4 + b.size * 4 + B * H * 4),
    )

    return pl.pallas_call(
        _encoder_kernel,
        out_shape=jax.ShapeDtypeStruct((B, H), jnp.float32),
        grid_spec=pltpu.PrefetchScalarGridSpec(
            num_scalar_prefetch=0,
            grid=(n_tiles,),                                      # 1 step for toy config
            in_specs=[
                pl.BlockSpec((TB * L, 1), lambda i: (i, 0)),      # token ids for tile i
                pl.BlockSpec((V, H), lambda i: (0, 0)),           # emb table (resident)
                pl.BlockSpec((H, H), lambda i: (0, 0)),           # W (resident)
                pl.BlockSpec((1, H), lambda i: (0, 0)),           # bias (resident)
            ],
            out_specs=pl.BlockSpec((TB, H), lambda i: (i, 0)),
        ),
        compiler_params=pltpu.CompilerParams(
            dimension_semantics=("parallel",)),
        cost_estimate=cost,
    )(tok_col, emb_table, w, b2d)


def reference_forward(tokens, emb_table, w, b):
    e = jnp.take(emb_table, tokens, axis=0)          # (B, L, H)
    y = jnp.einsum("blh,kh->blk", e, w) + b          # (B, L, H)
    return jnp.max(y, axis=1)                        # (B, H)


if __name__ == "__main__":
    # Small config consistent with the module: vocab_size=30, hidden_size=32, max_length=8
    VOCAB = 30
    HIDDEN = 32
    MAXLEN = 8
    BATCH = 2

    key = jax.random.PRNGKey(0)
    k_emb, k_w, k_b, k_tok = jax.random.split(key, 4)

    # nn.Embedding(vocab_size + 1, hidden_size, padding_idx=0): row 0 is zeros.
    emb_table = jax.random.normal(k_emb, (VOCAB + 1, HIDDEN), dtype=jnp.float32) * 0.1
    emb_table = emb_table.at[0].set(0.0)
    # nn.Linear(hidden_size, hidden_size): weight (out, in), bias (out,)
    w = jax.random.normal(k_w, (HIDDEN, HIDDEN), dtype=jnp.float32) * 0.1
    b = jax.random.normal(k_b, (HIDDEN,), dtype=jnp.float32) * 0.1

    # Token ids in [0, VOCAB]; include some padding (0) tokens.
    tokens = jax.random.randint(k_tok, (BATCH, MAXLEN), 0, VOCAB + 1, dtype=jnp.int32)
    tokens = tokens.at[:, -2:].set(0)

    out = sentence_encoder_forward(tokens, emb_table, w, b)
    out = jax.block_until_ready(out)

    ref = reference_forward(tokens, emb_table, w, b)
    assert out.shape == (BATCH, HIDDEN)
    assert jnp.allclose(out, ref, atol=1e-5, rtol=1e-5)
    print("KERNEL_OK")
</pallas_src>

<mosaic_0001>
module attributes {stable_mosaic.version = 11 : i64} {
  func.func @_encoder_kernel(%arg0: i32, %arg1: memref<16x1xi32, #tpu.memory_space<vmem>>, %arg2: memref<31x32xf32, #tpu.memory_space<vmem>>, %arg3: memref<32x32xf32, #tpu.memory_space<vmem>>, %arg4: memref<1x32xf32, #tpu.memory_space<vmem>>, %arg5: memref<2x32xf32, #tpu.memory_space<vmem>>) attributes {dimension_semantics = [#tpu.dimension_semantics<parallel>], iteration_bounds = array<i64: 1>, scalar_prefetch = 0 : i64, scratch_operands = 0 : i64, tpu.core_type = #tpu.core_type<tc>, window_params = [{transform_indices = @transform_0, window_bounds = array<i64: 16, 1>}, {pipeline_mode = #tpu.pipeline_mode<synchronous>, transform_indices = @transform_1, window_bounds = array<i64: 31, 32>}, {pipeline_mode = #tpu.pipeline_mode<synchronous>, transform_indices = @transform_2, window_bounds = array<i64: 32, 32>}, {pipeline_mode = #tpu.pipeline_mode<synchronous>, transform_indices = @transform_3, window_bounds = array<i64: 1, 32>}, {transform_indices = @transform_4, window_bounds = array<i64: 2, 32>}]} {
    %c0 = arith.constant 0 : index
    %c0_0 = arith.constant 0 : index
    %0 = vector.load %arg1[%c0, %c0_0] : memref<16x1xi32, #tpu.memory_space<vmem>>, vector<16x1xi32>
    %1 = tpu.iota {dimensions = array<i32: 1>} : vector<16x31xi32>
    %2 = vector.broadcast %0 : vector<16x1xi32> to vector<16x31xi32>
    %3 = arith.cmpi eq, %2, %1 : vector<16x31xi32>
    %4 = arith.extui %3 : vector<16x31xi1> to vector<16x31xi32>
    %5 = arith.sitofp %4 : vector<16x31xi32> to vector<16x31xf32>
    %c0_1 = arith.constant 0 : index
    %c0_2 = arith.constant 0 : index
    %6 = vector.load %arg2[%c0_1, %c0_2] : memref<31x32xf32, #tpu.memory_space<vmem>>, vector<31x32xf32>
    %cst = arith.constant dense<0.000000e+00> : vector<16x32xf32>
    %7 = tpu.matmul %5, %6, %cst {dimension_numbers = #tpu.dot_dimension_numbers<[1], [0], [0], [1], [0, 0, 1, 1], [], []>} : vector<16x31xf32>, vector<31x32xf32>, vector<16x32xf32> -> vector<16x32xf32>
    %c0_3 = arith.constant 0 : index
    %c0_4 = arith.constant 0 : index
    %8 = vector.load %arg3[%c0_3, %c0_4] : memref<32x32xf32, #tpu.memory_space<vmem>>, vector<32x32xf32>
    %cst_5 = arith.constant dense<0.000000e+00> : vector<16x32xf32>
    %9 = tpu.matmul %7, %8, %cst_5 {dimension_numbers = #tpu.dot_dimension_numbers<[1], [1], [0], [0], [0, 0, 1, 0], [], []>} : vector<16x32xf32>, vector<32x32xf32>, vector<16x32xf32> -> vector<16x32xf32>
    %10 = vector.extract_strided_slice %9 {offsets = [0, 0], sizes = [8, 32], strides = [1, 1]} : vector<16x32xf32> to vector<8x32xf32>
    %cst_6 = arith.constant dense<0xFF800000> : vector<32xf32>
    %11 = vector.multi_reduction <maximumf>, %10, %cst_6 [0] : vector<8x32xf32> to vector<32xf32>
    %12 = vector.shape_cast %11 : vector<32xf32> to vector<1x32xf32>
    %13 = vector.extract_strided_slice %9 {offsets = [8, 0], sizes = [8, 32], strides = [1, 1]} : vector<16x32xf32> to vector<8x32xf32>
    %cst_7 = arith.constant dense<0xFF800000> : vector<32xf32>
    %14 = vector.multi_reduction <maximumf>, %13, %cst_7 [0] : vector<8x32xf32> to vector<32xf32>
    %15 = vector.shape_cast %14 : vector<32xf32> to vector<1x32xf32>
    %16 = tpu.concatenate %12, %15 in 0 : vector<1x32xf32>, vector<1x32xf32> -> vector<2x32xf32>
    %c0_8 = arith.constant 0 : index
    %c0_9 = arith.constant 0 : index
    %17 = vector.load %arg4[%c0_8, %c0_9] : memref<1x32xf32, #tpu.memory_space<vmem>>, vector<1x32xf32>
    %18 = vector.broadcast %17 : vector<1x32xf32> to vector<2x32xf32>
    %19 = arith.addf %16, %18 : vector<2x32xf32>
    %c0_10 = arith.constant 0 : index
    %c0_11 = arith.constant 0 : index
    %20 = vector.load %arg5[%c0_10, %c0_11] : memref<2x32xf32, #tpu.memory_space<vmem>>, vector<2x32xf32>
    tpu.vector_store %arg5[%c0_10, %c0_11], %19 {strides = array<i32>} : memref<2x32xf32, #tpu.memory_space<vmem>>, vector<2x32xf32>,
    return
  }
  func.func @transform_0(%arg0: i32) -> (i32, i32) {
    %c0_i32 = arith.constant 0 : i32
    %c0_i32_0 = arith.constant 0 : i32
    return %arg0, %c0_i32 : i32, i32
  }
  func.func @transform_1(%arg0: i32) -> (i32, i32) {
    %c0_i32 = arith.constant 0 : i32
    %c0_i32_0 = arith.constant 0 : i32
    %c0_i32_1 = arith.constant 0 : i32
    return %c0_i32, %c0_i32_0 : i32, i32
  }
  func.func @transform_2(%arg0: i32) -> (i32, i32) {
    %c0_i32 = arith.constant 0 : i32
    %c0_i32_0 = arith.constant 0 : i32
    %c0_i32_1 = arith.constant 0 : i32
    return %c0_i32, %c0_i32_0 : i32, i32
  }
  func.func @transform_3(%arg0: i32) -> (i32, i32) {
    %c0_i32 = arith.constant 0 : i32
    %c0_i32_0 = arith.constant 0 : i32
    %c0_i32_1 = arith.constant 0 : i32
    return %c0_i32, %c0_i32_0 : i32, i32
  }
  func.func @transform_4(%arg0: i32) -> (i32, i32) {
    %c0_i32 = arith.constant 0 : i32
    %c0_i32_0 = arith.constant 0 : i32
    return %arg0, %c0_i32 : i32, i32
  }
}

</mosaic_0001>

<bundles_post_ra>
// kernel: tpu_custom_call.1
= control target key start
LH: loop header
LB: loop body
LE: loop exit
PB: predicated region body
PF: predicated region fallthrough
CT: control target
= control target key end

     0   :  { %9 = vsyncpa [#allocation3], 0  ;;  %s525_s0 = inlined_call_operand.vmem [shape: s32[16,1], index: 0, kind: input, shape index: {}]   ;;  %s526_s1 = inlined_call_operand.hbm [shape: f32[31,32], index: 1, kind: input, shape index: {}]   ;;  %s527_s2 = inlined_call_operand.hbm [shape: f32[32,32], index: 2, kind: input, shape index: {}]   ;;  %s528_s3 = inlined_call_operand.vmem [shape: f32[1,32], index: 3, kind: input, shape index: {}]   ;;  %s529_s4 = inlined_call_operand.hbm [shape: f32[2,32], index: 4, kind: output, shape index: {}]  }
   0x1   :  { %10 = vsyncpa [#allocation6], 0 }
   0x2   :  { %11 = vsyncpa [#allocation4], 0  ;;  %s441_s15 = smov [#allocation2]   ;;  %s369_s19 = scalar_lea.hbm %s526_s1, 512 }
   0x3   :  { %s19_s16 = sshll.u32 %s441_s15, 4  ;;  %p370_p0 = scmp.ne.s32.totalorder %s526_s1, %s369_s19  ;;  %s20_s16 = int_to_ptr.vmem [resolvable:$true] %s19_s16 }
   0x4   :  { %p373_p1 = scmp.lt.u32.totalorder %s369_s19, %s526_s1 }
   0x6   :  { %p375_p2 = pnand %p373_p1, %p370_p0 }
   0x8   :  { %378 = shalt.err (!%p375_p2)
}
   0x9   :  { %s379_s24 = scalar_lea.vmem %s20_s16, 512  ;;  %p384_p4 = scmp.lt.s32.totalorder %s20_s16, %s20_s16 }
   0xa   :  { %p380_p3 = scmp.ne.s32.totalorder %s20_s16, %s379_s24  ;;  %p385_p5 = scmp.lt.s32.totalorder %s379_s24, %s379_s24 }
   0xc   :  { %p386_p6 = por %p385_p5, %p384_p4 }
   0xe   :  { %p387_p7 = pnand %p386_p6, %p380_p3 }
  0x10   :  { %390 = shalt.err (!%p387_p7)
}
  0x11   :  { %s442_s25 = smov 128   ;;  %s443_s26 = smov 8  }
  0x12   :  { %25 = dma.hbm_to_vmem [thread:$0]  %s526_s1, 512, %s20_s16, [#allocation3], %s442_s25, %s442_s25, %s443_s26  }
  0x13   :  { %s444_s29 = smov [#allocation5]   ;;  %s391_s7 = scalar_lea.hbm %s527_s2, 512 }
  0x14   :  { %s31_s30 = sshll.u32 %s444_s29, 4  ;;  %p392_p8 = scmp.ne.s32.totalorder %s527_s2, %s391_s7  ;;  %s32_s30 = int_to_ptr.vmem [resolvable:$true] %s31_s30 }
  0x15   :  { %p395_p9 = scmp.lt.u32.totalorder %s391_s7, %s527_s2 }
  0x17   :  { %p397_p10 = pnand %p395_p9, %p392_p8 }
  0x19   :  { %400 = shalt.err (!%p397_p10)
}
  0x1a   :  { %s401_s12 = scalar_lea.vmem %s32_s30, 512  ;;  %p406_p12 = scmp.lt.s32.totalorder %s32_s30, %s32_s30 }
  0x1b   :  { %p402_p11 = scmp.ne.s32.totalorder %s32_s30, %s401_s12  ;;  %p407_p13 = scmp.lt.s32.totalorder %s401_s12, %s401_s12 }
  0x1d   :  { %p408_p0 = por %p407_p13, %p406_p12 }
  0x1f   :  { %p409_p1 = pnand %p408_p0, %p402_p11 }
  0x21   :  { %412 = shalt.err (!%p409_p1)
}
  0x22   :  { %37 = dma.hbm_to_vmem [thread:$0]  %s527_s2, 512, %s32_s30, [#allocation6], %s442_s25, %s442_s25, %s443_s26  }
  0x23   :  { %435 = dma.done.wait [#allocation3], 512  }
  0x24   :  { %436 = vsyncadd [#allocation3], 4294966784 }
  0x25   :  { %437 = dma.done.wait [#allocation6], 512  }
  0x26   :  { %438 = vsyncadd [#allocation6], 4294966784  ;;  %v445_v0 = vmov 0   ;;  %v46_v1 = vld [vmem:[%s525_s0] sm:$0xff]  ;;  %v62_v2 = vld [vmem:[#allocation2] sm:$0xff]  ;;  %vm73_vm0 = vcmask 1046528   ;;  %v48_v15 = vlaneseq }
  0x27   :  { %368 = vset.pattern.permute.xlu0 %v445_v0  ;;  %v63_v3 = vld [vmem:[#allocation2 + $0x8] sm:$0xff]  ;;  %v64_v4 = vld [vmem:[#allocation2 + $0x10] sm:$0xff]  ;;  %v65_v5 = vld [vmem:[#allocation2 + $0x18] sm:$0x7f]  ;;  %vm446_vm1 = vmmov 1   ;;  %vm156_vm3 = vcmask 261120  }
  0x28   :  { %51 = vperm.xlu0 %368, %v46_v1   ;;  %v47_v6 = vld [vmem:[%s525_s0 + $0x8] sm:$0xff]  ;;  %v338_v7 = vpack.c.bf16 %v63_v3, %v62_v2  ;;  %v342_v8 = vpack.c.bf16 %v65_v5, %v64_v4  ;;  %vm343_vm2 = vmpackc.low %vm73_vm0, %vm446_vm1  ;;  %v152_v9 = vld [vmem:[#allocation5] sm:$0xff]  ;;  %v49_v16 = vand.u32 127, %v48_v15  ;;  %vm66_vm5 = vcmask 252928   ;;  %s448_s18 = smov [#allocation7]  }
  0x29   :  { %v153_v10 = vld [vmem:[#allocation5 + $0x8] sm:$0xff]  ;;  %v154_v11 = vld [vmem:[#allocation5 + $0x10] sm:$0xff]  ;;  %vm349_vm4 = vmpackc.low %vm156_vm3, %vm156_vm3  ;;  %v447_v18 = vmov 0.0   ;;  %vm264_vm8 = vcmask 1040384   ;;  %s282_s19 = sshll.u32 %s448_s18, 4  ;;  %vm274_vm9 = vcmask 254976   ;;  %s283_s19 = int_to_ptr.vmem [resolvable:$true] %s282_s19 }
  0x2a   :  { %339 = vmatprep.subr.bf16.mxu0 %v338_v7  ;;  %v348_v12 = vpack.c.bf16 %v153_v10, %v152_v9  ;;  %v155_v13 = vld [vmem:[#allocation5 + $0x18] sm:$0xff]  ;;  %v303_v40 = vld [vmem:[%s528_s3] ss:$0 sm:$0xff]  ;;  %s413_s20 = scalar_lea.vmem %s283_s19, 32  ;;  %p418_p3 = scmp.lt.s32.totalorder %s283_s19, %s283_s19 }
  0x2b   :  { %341 = vmatpush3.bf16.msra.mxu0 %v338_v7  ;;  %v354_v14 = vpack.c.bf16 %v155_v13, %v154_v11  ;;  %p414_p2 = scmp.ne.s32.totalorder %s283_s19, %s413_s20  ;;  %p419_p4 = scmp.lt.s32.totalorder %s413_s20, %s413_s20 }
  0x2c   :  { %54 = vperm.xlu0 %368, %v47_v6   ;;  %344 = vmatprep.subr.msk.bf16.mxu0 %vm343_vm2, %v342_v8 }
  0x2d   :  { %350 = vmatprep.subr.msk.bf16.mxu1 %vm349_vm4, %v348_v12  ;;  %p420_p5 = por %p419_p4, %p418_p3 }
  0x2e   :  { %353 = vmatpush3.bf16.xpose.msk.msra.mxu1 %vm349_vm4, %v348_v12 }
  0x2f   :  { %347 = vmatpush3.bf16.msk.msra.mxu0 %vm343_vm2, %v342_v8  ;;  %356 = vmatprep.subr.msk.bf16.mxu1 %vm349_vm4, %v354_v14  ;;  %p421_p6 = pnand %p420_p5, %p414_p2 }
  0x36   :  { %359 = vmatpush3.bf16.xpose.msk.msra.mxu1 %vm349_vm4, %v354_v14 }
  0xa7   :  { %v52_v17 = vpop.permute.xlu0 %51 }
  0xa8   :  { %vm56_vm6 = vcmp.eq.s32.totalorder %v52_v17, %v49_v16 }
  0xa9   :  { %v292_v19 = vsel %vm56_vm6, 1.0, %v447_v18 }
  0xaa   :  { %324 = vmatprep.mubr.msk.f32.mxu0 %vm66_vm5, %v292_v19 }
  0xab   :  { %v55_v20 = vpop.permute.xlu0 %54 }
  0xac   :  { %vm57_vm7 = vcmp.eq.s32.totalorder %v55_v20, %v49_v16 }
  0xad   :  { %v293_v21 = vsel %vm57_vm7, 1.0, %v447_v18 }
  0xae   :  { %325 = vmatmul.mubr.msk.f32.vlgmr.msra.gmra.mrb[0].mxu0 %vm66_vm5, %v293_v21 }
 0x181   :  { %v326_v22 = vpop.f32.mrb[0].mxu0 }
 0x182   :  { %v143_v23 = vpop.f32.mrb[1].mxu0 }
 0x183   :  { %335 = vmatprep.mubr.msk.f32.mxu1 %vm156_vm3, %v143_v23 }
 0x184   :  { %336 = vmatmul.mubr.msk.f32.vlgmr.msra.gmra.mrb[0].mxu1 %vm156_vm3, %v326_v22 }
 0x257   :  { %v337_v24 = vpop.f32.mrb[0].mxu1 }
 0x258   :  { %v257_v25 = vsel %vm156_vm3, %v337_v24, -inf  ;;  %v241_v26 = vpop.f32.mrb[1].mxu1 }
 0x259   :  { %v258_v27 = vrot.slane %v257_v25, 4  ;;  %v250_v28 = vsel %vm156_vm3, %v241_v26, -inf }
 0x25a   :  { %v251_v29 = vrot.slane %v250_v28, 4 }
 0x25b   :  { %v259_v30 = vmax.f32 %v257_v25, %v258_v27 }
 0x25c   :  { %v252_v31 = vmax.f32 %v250_v28, %v251_v29 }
 0x25d   :  { %v260_v32 = vrot.slane %v259_v30, 2 }
 0x25e   :  { %v253_v33 = vrot.slane %v252_v31, 2 }
 0x25f   :  { %v261_v34 = vmax.f32 %v259_v30, %v260_v32 }
 0x260   :  { %v254_v35 = vmax.f32 %v252_v31, %v253_v33 }
 0x261   :  { %v262_v36 = vrot.slane %v261_v34, 1 }
 0x262   :  { %v255_v37 = vrot.slane %v254_v35, 1 }
 0x263   :  { %v263_v38 = vmax.f32 %v261_v34, %v262_v36 }
 0x264   :  { %v256_v39 = vmax.f32 %v254_v35, %v255_v37 }
 0x266   :  { %v265_v41 = vsel %vm264_vm8, %v256_v39, %v263_v38 }
 0x267   :  { %v273_v42 = vadd.f32 %v303_v40, %v265_v41 }
 0x269   :  { %275 = vst.msk [vmem:[#allocation7] sm:$0x3] %vm274_vm9, %v273_v42 }
 0x26a   :  { %424 = shalt.err (!%p421_p6)
}
 0x26b   :  { %s425_s23 = scalar_lea.hbm %s529_s4, 32 }
 0x26c   :  { %p426_p7 = scmp.ne.s32.totalorder %s529_s4, %s425_s23  ;;  %p429_p8 = scmp.lt.u32.totalorder %s425_s23, %s529_s4 }
 0x26e   :  { %p431_p9 = pnand %p429_p8, %p426_p7 }
 0x270   :  { %434 = shalt.err (!%p431_p9)
}
 0x271   :  { %285 = dma.vmem_to_hbm [thread:$0]  %s283_s19, 32, %s529_s4, [#allocation4]  }
 0x272   :  { %439 = dma.done.wait [#allocation4], 32  }
 0x273   :  { %440 = vsyncadd [#allocation4], 4294967264 }
 0x274   :  { %289 = vsyncpa [#allocation3], 1 }
 0x275   :  { %290 = vsyncpa [#allocation6], 1 }
 0x276   :  { %291 = vsyncpa [#allocation4], 1 }

</bundles_post_ra>
